<compile_context>
chip_gen: v6e
topology: v6e:2x2x1
jax: 0.10.0
libtpu: 0.0.40
codegen_flags: <defaults>
</compile_context>

<pallas_src>
import numpy as np
import jax
import jax.numpy as jnp
from jax.experimental import pallas as pl
from jax.experimental.pallas import tpu as pltpu


def se_gnn_kernel(x_ref, w1t_ref, w2t_ref, gw_ref, gb_ref, adjt_ref, o_ref):
    blk_b, c, n = x_ref.shape
    x = x_ref[...]                                               # (Bb, C, N) f32

    # --- SE gate: per-batch global average pool + 2-layer MLP + sigmoid -------
    y = jnp.mean(x, axis=-1)                                     # (Bb, C)  lane reduce
    y1 = jnp.dot(y.astype(jnp.bfloat16), w1t_ref[...],
                 preferred_element_type=jnp.float32)             # (Bb, CR)
    y1 = jnp.maximum(y1, 0.0)
    y2 = jnp.dot(y1.astype(jnp.bfloat16), w2t_ref[...],
                 preferred_element_type=jnp.float32)             # (Bb, C)
    gate = 1.0 / (1.0 + jnp.exp(-y2))                            # sigmoid, f32 (EUP)
    xs = x * gate[:, :, None]                                    # (Bb, C, N) f32

    # --- Normalized-adjacency aggregation over the node (lane) axis -----------
    # agg[(b,c), dst] = sum_src xs[(b,c), src] * A_norm[dst, src]
    xs2 = xs.reshape(blk_b * c, n).astype(jnp.bfloat16)          # free major-dim merge
    agg = jnp.dot(xs2, adjt_ref[...],
                  preferred_element_type=jnp.float32)            # (Bb*C, N) f32
    o_ref[...] = agg.reshape(blk_b, c, n)

    # --- GCN linear (shared (C, C) weight) + bias, per batch, in place --------
    gw = gw_ref[...]                                             # (C, C)  bf16
    bias = gb_ref[...]                                           # (C, 1)  f32

    def mix(b, carry):
        o_ref[b] = jnp.dot(gw, o_ref[b].astype(jnp.bfloat16),
                           preferred_element_type=jnp.float32) + bias
        return carry

    jax.lax.fori_loop(0, blk_b, mix, 0)


def build_gcn_norm_adj(h, w):
    """Dense normalized adjacency matching torch_geometric's gcn_norm (directed
    down/right grid edges + self-loops, in-degree sym-sqrt norm)."""
    n = h * w
    edges = []
    for i in range(h):
        for j in range(w):
            idx = i * w + j
            if i + 1 < h:
                edges.append((idx, (i + 1) * w + j))
            if j + 1 < w:
                edges.append((idx, i * w + (j + 1)))
    edges += [(k, k) for k in range(n)]                       # self-loops
    row = np.array([e[0] for e in edges], dtype=np.int64)
    col = np.array([e[1] for e in edges], dtype=np.int64)
    deg = np.zeros(n, dtype=np.float64)
    np.add.at(deg, col, 1.0)                                  # in-degree (target side)
    dinv = deg ** -0.5
    dinv[np.isinf(dinv)] = 0.0
    a = np.zeros((n, n), dtype=np.float32)
    a[col, row] = (dinv[row] * dinv[col]).astype(np.float32)  # A_norm[dst, src]
    return a


def _vmem_capacity_bytes():
    try:
        return int(pltpu.get_tpu_info().vmem_capacity_bytes)
    except Exception:
        return 64 << 20                 # conservative: v7x per-TensorCore VMEM


def _pick_block_batches(b, c, n, vmem_cap):
    """Batches per grid step. Per-stream block target is big enough to amortize
    the ~0.35us/step overhead and hit the good DMA-tile class, small enough
    that double-buffered in+out blocks plus temporaries fit VMEM with headroom
    (v7x: 64 MiB physical; v5e/v6e: 128 MiB)."""
    target = min(4 << 20, max(512 << 10, vmem_cap // 64))
    per_batch = c * n * 4
    bb = max(1, min(b, target // per_batch))
    if b >= 2:
        bb = min(bb, b // 2)            # keep >= 2 grid steps: v7x has 2 TensorCores
    while bb > 1 and b % bb:            # blocks must tile the batch dim exactly
        bb -= 1
    return bb


def se_attention_gnn(x, fc1_w, fc2_w, gcn_w, gcn_b):
    b, c, h, w = x.shape
    n = h * w
    cr = fc1_w.shape[0]

    vmem_cap = _vmem_capacity_bytes()
    bb = _pick_block_batches(b, c, n, vmem_cap)
    g = b // bb

    # Free reshape only -- no host-side transpose pass over x (or the output).
    x3 = x.reshape(b, c, n).astype(jnp.float32)

    # Small resident operands (fetched once, a few KiB each).
    w1t = fc1_w.T.astype(jnp.bfloat16)                 # (C, CR)
    w2t = fc2_w.T.astype(jnp.bfloat16)                 # (CR, C)
    gwb = gcn_w.astype(jnp.bfloat16)                   # (C, C)
    gb2 = gcn_b.reshape(c, 1).astype(jnp.float32)      # (C, 1)
    # Transposed so the kernel does a right-matmul over the node/lane axis.
    adjt = jnp.asarray(build_gcn_norm_adj(h, w).T, dtype=jnp.bfloat16)   # (N, N)

    # Explicit VMEM budget: 2x double-buffered x + out blocks (lane-padded to
    # 128) plus in-kernel temporaries, capped well under the chip's capacity.
    lane_pad = -(-n // 128) * 128
    sub_pad = -(-c // 8) * 8
    blk_vmem = bb * sub_pad * lane_pad * 4
    vmem_need = 4 * blk_vmem + 6 * blk_vmem + (4 << 20)
    vmem_limit = int(min(max(vmem_need, 16 << 20), (3 * vmem_cap) // 4))

    cost = pl.CostEstimate(
        flops=int(2 * b * c * n * (n + c) + 4 * b * c * cr + 2 * b * c * n),
        transcendentals=int(b * c),
        bytes_accessed=int(8 * b * c * n + 2 * (2 * c * cr + c * c + n * n) + 4 * c),
    )

    out = pl.pallas_call(
        se_gnn_kernel,
        out_shape=jax.ShapeDtypeStruct((b, c, n), jnp.float32),
        grid_spec=pltpu.PrefetchScalarGridSpec(
            num_scalar_prefetch=0,
            grid=(g,),
            in_specs=[
                pl.BlockSpec((bb, c, n), lambda i: (i, 0, 0)),   # x batch block
                pl.BlockSpec((c, cr), lambda i: (0, 0)),         # fc1^T
                pl.BlockSpec((cr, c), lambda i: (0, 0)),         # fc2^T
                pl.BlockSpec((c, c), lambda i: (0, 0)),          # gcn weight
                pl.BlockSpec((c, 1), lambda i: (0, 0)),          # gcn bias
                pl.BlockSpec((n, n), lambda i: (0, 0)),          # A_norm^T
            ],
            out_specs=pl.BlockSpec((bb, c, n), lambda i: (i, 0, 0)),
        ),
        compiler_params=pltpu.CompilerParams(
            dimension_semantics=("parallel",),
            vmem_limit_bytes=vmem_limit),
        cost_estimate=cost,
    )(x3, w1t, w2t, gwb, gb2, adjt)

    # Output kept f32 for the f32 consumer/reference; switch the out_shape dtype
    # to bf16 if a downstream consumer accepts it (halves writeback bytes).
    return out.reshape(b, c, h, w)


def reference_forward(x, fc1_w, fc2_w, gcn_w, gcn_b, a_norm):
    """Pure-JAX f32 reference mirroring the PyTorch forward (dense adjacency)."""
    b, c, h, w = x.shape
    y = x.mean(axis=(2, 3))                                        # (b, c)
    y = jax.nn.sigmoid(jnp.maximum(y @ fc1_w.T, 0.0) @ fc2_w.T)    # (b, c)
    xs = x * y[:, :, None, None]
    xf = xs.reshape(b, c, h * w).transpose(0, 2, 1)                # (b, N, c)
    xp = xf @ gcn_w.T                                              # (b, N, c)
    out = jnp.einsum("nm,bmc->bnc", jnp.asarray(a_norm), xp) + gcn_b
    return out.transpose(0, 2, 1).reshape(b, c, h, w)


if __name__ == "__main__":
    # Small shapes consistent with the module: channel=32, reduction=4, 8x8 grid,
    # B=4 so the grid keeps 2 parallel steps (keeps a second TensorCore busy on v7x).
    B, C, H, W = 4, 32, 8, 8
    RED = 4
    CR = C // RED

    key = jax.random.PRNGKey(0)
    kx, k1, k2, k3, k4 = jax.random.split(key, 5)
    x = jax.random.normal(kx, (B, C, H, W), dtype=jnp.float32)
    fc1_w = 0.1 * jax.random.normal(k1, (CR, C), dtype=jnp.float32)   # Linear(C, C//r)
    fc2_w = 0.1 * jax.random.normal(k2, (C, CR), dtype=jnp.float32)   # Linear(C//r, C)
    gcn_w = 0.1 * jax.random.normal(k3, (C, C), dtype=jnp.float32)    # GCNConv lin weight
    gcn_b = 0.1 * jax.random.normal(k4, (C,), dtype=jnp.float32)      # GCNConv bias

    out = se_attention_gnn(x, fc1_w, fc2_w, gcn_w, gcn_b)
    out = jax.block_until_ready(out)

    a_norm = build_gcn_norm_adj(H, W)
    ref = reference_forward(x, fc1_w, fc2_w, gcn_w, gcn_b, a_norm)
    # Tolerance relaxed vs. pure-f32 because MXU operands are bf16 (f32 accumulate).
    np.testing.assert_allclose(np.asarray(out), np.asarray(ref), rtol=2e-2, atol=2e-2)

    print("KERNEL_OK")
</pallas_src>

<mosaic_0001>
module attributes {stable_mosaic.version = 11 : i64} {
  func.func @se_gnn_kernel(%arg0: i32, %arg1: memref<2x32x64xf32, #tpu.memory_space<vmem>>, %arg2: memref<32x8xbf16, #tpu.memory_space<vmem>>, %arg3: memref<8x32xbf16, #tpu.memory_space<vmem>>, %arg4: memref<32x32xbf16, #tpu.memory_space<vmem>>, %arg5: memref<32x1xf32, #tpu.memory_space<vmem>>, %arg6: memref<64x64xbf16, #tpu.memory_space<vmem>>, %arg7: memref<2x32x64xf32, #tpu.memory_space<vmem>>) attributes {dimension_semantics = [#tpu.dimension_semantics<parallel>], iteration_bounds = array<i64: 2>, scalar_prefetch = 0 : i64, scratch_operands = 0 : i64, tpu.core_type = #tpu.core_type<tc>, window_params = [{transform_indices = @transform_0, window_bounds = array<i64: 2, 32, 64>}, {pipeline_mode = #tpu.pipeline_mode<synchronous>, transform_indices = @transform_1, window_bounds = array<i64: 32, 8>}, {pipeline_mode = #tpu.pipeline_mode<synchronous>, transform_indices = @transform_2, window_bounds = array<i64: 8, 32>}, {pipeline_mode = #tpu.pipeline_mode<synchronous>, transform_indices = @transform_3, window_bounds = array<i64: 32, 32>}, {pipeline_mode = #tpu.pipeline_mode<synchronous>, transform_indices = @transform_4, window_bounds = array<i64: 32, 1>}, {pipeline_mode = #tpu.pipeline_mode<synchronous>, transform_indices = @transform_5, window_bounds = array<i64: 64, 64>}, {transform_indices = @transform_6, window_bounds = array<i64: 2, 32, 64>}]} {
    %c0 = arith.constant 0 : index
    %c0_0 = arith.constant 0 : index
    %c0_1 = arith.constant 0 : index
    %0 = vector.load %arg1[%c0, %c0_0, %c0_1] : memref<2x32x64xf32, #tpu.memory_space<vmem>>, vector<2x32x64xf32>
    %cst = arith.constant dense<0.000000e+00> : vector<2x32xf32>
    %1 = vector.multi_reduction <add>, %0, %cst [2] : vector<2x32x64xf32> to vector<2x32xf32>
    %cst_2 = arith.constant 6.400000e+01 : f32
    %2 = vector.broadcast %cst_2 : f32 to vector<2x32xf32>
    %3 = arith.divf %1, %2 : vector<2x32xf32>
    %4 = arith.truncf %3 : vector<2x32xf32> to vector<2x32xbf16>
    %c0_3 = arith.constant 0 : index
    %c0_4 = arith.constant 0 : index
    %5 = vector.load %arg2[%c0_3, %c0_4] : memref<32x8xbf16, #tpu.memory_space<vmem>>, vector<32x8xbf16>
    %cst_5 = arith.constant dense<0.000000e+00> : vector<2x8xf32>
    %6 = tpu.matmul %4, %5, %cst_5 {dimension_numbers = #tpu.dot_dimension_numbers<[1], [0], [0], [1], [0, 0, 1, 1], [], []>} : vector<2x32xbf16>, vector<32x8xbf16>, vector<2x8xf32> -> vector<2x8xf32>
    %cst_6 = arith.constant 0.000000e+00 : f32
    %7 = vector.broadcast %cst_6 : f32 to vector<2x8xf32>
    %8 = arith.maximumf %6, %7 : vector<2x8xf32>
    %9 = arith.truncf %8 : vector<2x8xf32> to vector<2x8xbf16>
    %c0_7 = arith.constant 0 : index
    %c0_8 = arith.constant 0 : index
    %10 = vector.load %arg3[%c0_7, %c0_8] : memref<8x32xbf16, #tpu.memory_space<vmem>>, vector<8x32xbf16>
    %cst_9 = arith.constant dense<0.000000e+00> : vector<2x32xf32>
    %11 = tpu.matmul %9, %10, %cst_9 {dimension_numbers = #tpu.dot_dimension_numbers<[1], [0], [0], [1], [0, 0, 1, 1], [], []>} : vector<2x8xbf16>, vector<8x32xbf16>, vector<2x32xf32> -> vector<2x32xf32>
    %cst_10 = arith.constant 0.000000e+00 : f32
    %12 = vector.broadcast %cst_10 : f32 to vector<2x32xf32>
    %13 = arith.subf %12, %11 : vector<2x32xf32>
    %14 = math.exp %13 : vector<2x32xf32>
    %cst_11 = arith.constant 1.000000e+00 : f32
    %15 = vector.broadcast %cst_11 : f32 to vector<2x32xf32>
    %16 = arith.addf %15, %14 : vector<2x32xf32>
    %cst_12 = arith.constant 1.000000e+00 : f32
    %17 = vector.broadcast %cst_12 : f32 to vector<2x32xf32>
    %18 = arith.divf %17, %16 : vector<2x32xf32>
    %19 = vector.shape_cast %18 : vector<2x32xf32> to vector<2x32x1xf32>
    %20 = vector.broadcast %19 : vector<2x32x1xf32> to vector<2x32x64xf32>
    %21 = arith.mulf %0, %20 : vector<2x32x64xf32>
    %22 = vector.shape_cast %21 : vector<2x32x64xf32> to vector<64x64xf32>
    %23 = arith.truncf %22 : vector<64x64xf32> to vector<64x64xbf16>
    %c0_13 = arith.constant 0 : index
    %c0_14 = arith.constant 0 : index
    %24 = vector.load %arg6[%c0_13, %c0_14] : memref<64x64xbf16, #tpu.memory_space<vmem>>, vector<64x64xbf16>
    %cst_15 = arith.constant dense<0.000000e+00> : vector<64x64xf32>
    %25 = tpu.matmul %23, %24, %cst_15 {dimension_numbers = #tpu.dot_dimension_numbers<[1], [0], [0], [1], [0, 0, 1, 1], [], []>} : vector<64x64xbf16>, vector<64x64xbf16>, vector<64x64xf32> -> vector<64x64xf32>
    %26 = vector.shape_cast %25 : vector<64x64xf32> to vector<2x32x64xf32>
    %c0_16 = arith.constant 0 : index
    %c0_17 = arith.constant 0 : index
    %c0_18 = arith.constant 0 : index
    %27 = vector.load %arg7[%c0_16, %c0_17, %c0_18] : memref<2x32x64xf32, #tpu.memory_space<vmem>>, vector<2x32x64xf32>
    tpu.vector_store %arg7[%c0_16, %c0_17, %c0_18], %26 {strides = array<i32>} : memref<2x32x64xf32, #tpu.memory_space<vmem>>, vector<2x32x64xf32>,
    %c0_19 = arith.constant 0 : index
    %c0_20 = arith.constant 0 : index
    %28 = vector.load %arg4[%c0_19, %c0_20] : memref<32x32xbf16, #tpu.memory_space<vmem>>, vector<32x32xbf16>
    %c0_21 = arith.constant 0 : index
    %c0_22 = arith.constant 0 : index
    %29 = vector.load %arg5[%c0_21, %c0_22] : memref<32x1xf32, #tpu.memory_space<vmem>>, vector<32x1xf32>
    %c0_i32 = arith.constant 0 : i32
    %c2_i32 = arith.constant 2 : i32
    %30 = arith.addi %c0_i32, %c2_i32 : i32
    %c1_i32 = arith.constant 1 : i32
    scf.for %arg8 = %c0_i32 to %30 step %c1_i32  : i32 {
      %31 = arith.index_cast %arg8 : i32 to index
      %c0_24 = arith.constant 0 : index
      %c0_25 = arith.constant 0 : index
      %32 = vector.load %arg7[%31, %c0_24, %c0_25] : memref<2x32x64xf32, #tpu.memory_space<vmem>>, vector<1x32x64xf32>
      %33 = vector.shape_cast %32 : vector<1x32x64xf32> to vector<32x64xf32>
      %34 = arith.truncf %33 : vector<32x64xf32> to vector<32x64xbf16>
      %cst_26 = arith.constant dense<0.000000e+00> : vector<32x64xf32>
      %35 = tpu.matmul %28, %34, %cst_26 {dimension_numbers = #tpu.dot_dimension_numbers<[1], [0], [0], [1], [0, 0, 1, 1], [], []>} : vector<32x32xbf16>, vector<32x64xbf16>, vector<32x64xf32> -> vector<32x64xf32>
      %36 = vector.broadcast %29 : vector<32x1xf32> to vector<32x64xf32>
      %37 = arith.addf %35, %36 : vector<32x64xf32>
      %38 = arith.index_cast %arg8 : i32 to index
      %c0_27 = arith.constant 0 : index
      %c0_28 = arith.constant 0 : index
      %39 = vector.load %arg7[%38, %c0_27, %c0_28] : memref<2x32x64xf32, #tpu.memory_space<vmem>>, vector<1x32x64xf32>
      %40 = vector.shape_cast %39 : vector<1x32x64xf32> to vector<32x64xf32>
      %41 = vector.shape_cast %37 : vector<32x64xf32> to vector<1x32x64xf32>
      tpu.vector_store %arg7[%38, %c0_27, %c0_28], %41 {strides = array<i32>} : memref<2x32x64xf32, #tpu.memory_space<vmem>>, vector<1x32x64xf32>,
    }
    %c2_i32_23 = arith.constant 2 : i32
    return
  }
  func.func @transform_0(%arg0: i32) -> (i32, i32, i32) {
    %c0_i32 = arith.constant 0 : i32
    %c0_i32_0 = arith.constant 0 : i32
    %c0_i32_1 = arith.constant 0 : i32
    return %arg0, %c0_i32, %c0_i32_0 : i32, i32, i32
  }
  func.func @transform_1(%arg0: i32) -> (i32, i32) {
    %c0_i32 = arith.constant 0 : i32
    %c0_i32_0 = arith.constant 0 : i32
    %c0_i32_1 = arith.constant 0 : i32
    return %c0_i32, %c0_i32_0 : i32, i32
  }
  func.func @transform_2(%arg0: i32) -> (i32, i32) {
    %c0_i32 = arith.constant 0 : i32
    %c0_i32_0 = arith.constant 0 : i32
    %c0_i32_1 = arith.constant 0 : i32
    return %c0_i32, %c0_i32_0 : i32, i32
  }
  func.func @transform_3(%arg0: i32) -> (i32, i32) {
    %c0_i32 = arith.constant 0 : i32
    %c0_i32_0 = arith.constant 0 : i32
    %c0_i32_1 = arith.constant 0 : i32
    return %c0_i32, %c0_i32_0 : i32, i32
  }
  func.func @transform_4(%arg0: i32) -> (i32, i32) {
    %c0_i32 = arith.constant 0 : i32
    %c0_i32_0 = arith.constant 0 : i32
    %c0_i32_1 = arith.constant 0 : i32
    return %c0_i32, %c0_i32_0 : i32, i32
  }
  func.func @transform_5(%arg0: i32) -> (i32, i32) {
    %c0_i32 = arith.constant 0 : i32
    %c0_i32_0 = arith.constant 0 : i32
    %c0_i32_1 = arith.constant 0 : i32
    return %c0_i32, %c0_i32_0 : i32, i32
  }
  func.func @transform_6(%arg0: i32) -> (i32, i32, i32) {
    %c0_i32 = arith.constant 0 : i32
    %c0_i32_0 = arith.constant 0 : i32
    %c0_i32_1 = arith.constant 0 : i32
    return %arg0, %c0_i32, %c0_i32_0 : i32, i32, i32
  }
}

</mosaic_0001>

<bundles_post_ra>
// kernel: tpu_custom_call.1
= control target key start
LH: loop header
LB: loop body
LE: loop exit
PB: predicated region body
PF: predicated region fallthrough
CT: control target
= control target key end

     0   :  { %11 = vsyncpa [#allocation3], 0  ;;  %s1514_s0 = inlined_call_operand.hbm [shape: f32[4,32,64], index: 0, kind: input, shape index: {}]   ;;  %s1515_s1 = inlined_call_operand.vmem [shape: bf16[32,8], index: 1, kind: input, shape index: {}]   ;;  %s1516_s2 = inlined_call_operand.vmem [shape: bf16[8,32], index: 2, kind: input, shape index: {}]   ;;  %s1517_s3 = inlined_call_operand.vmem [shape: bf16[32,32], index: 3, kind: input, shape index: {}]   ;;  %s1518_s4 = inlined_call_operand.vmem [shape: f32[32,1], index: 4, kind: input, shape index: {}]   ;;  %s1519_s5 = inlined_call_operand.vmem [shape: bf16[64,64], index: 5, kind: input, shape index: {}]   ;;  %s1520_s6 = inlined_call_operand.hbm [shape: f32[4,32,64], index: 6, kind: output, shape index: {}]  }
   0x1   :  { %13 = vsyncpa [#allocation3 + $0x1], 0 }
   0x2   :  { %14 = vsyncpa [#allocation4], 0 }
   0x3   :  { %16 = vsyncpa [#allocation4 + $0x1], 0  ;;  %s1182_s21 = smov 0   ;;  %s1184_s22 = smov 0  }
   0x4   :  { %s1186_s23 = smov 0   ;;  %s1188_s24 = smov 0  }
   0x5 LB: > { %s1203_s25 = sadd.s32 4294967295, %s1132_s24   ;;  %s871_s26 = sadd.s32 4294967294, %s1132_s24   ;;  %s1132_s24 = sphi %s1188_s24, %s1535_s24   ;;  %s1128_s23 = sphi %s1186_s23, %s1534_s23   ;;  %s1124_s22 = sphi %s1184_s22, %s1533_s22   ;;  %s1120_s21 = sphi %s1182_s21, %s1532_s21  }
   0x6   : > { %s1207_s27 = sadd.s32 1, %s1132_s24   ;;  %s29_s28 = sadd.s32 1, %s1128_s23 }
   0x7   : > { %s26_s29 = ssub.s32 %s1132_s24, %s1207_s27  ;;  %p36_p0 = scmp.ne.s32.totalorder %s1128_s23, %s1124_s22 }
   0x8   : > { %p27_p1 = scmp.eq.s32.totalorder %s26_s29, 0  ;;  %p37_p2 = scmp.eq.s32.totalorder %s1132_s24, 0 }
   0x9   : > { %p42_p3 = scmp.ne.s32.totalorder %s1124_s22, %s1120_s21  ;;  %p43_p4 = scmp.eq.s32.totalorder %s1203_s25, 0 }
   0xa   : > { %s1219_s30 = scalar_select %p27_p1, %s1128_s23, %s29_s28  }
   0xb   : > { %p1221_p5 = por %p37_p2, %p36_p0  ;;  %p1225_p6 = por %p43_p4, %p42_p3 }
   0xc   : > { %p171_p7 = scmp.eq.s32.totalorder %s1203_s25, 1  ;;  %p177_p8 = scmp.eq.s32.totalorder %s871_s26, 1 }
   0xd   : > { %s1524_s8 = scalar_select %p1225_p6, 1, 0 }
   0xe   : > { %p975_p10 = scmp.lt.s32.totalorder %s1132_s24, 2  ;;  %p1232_p11 = por %p171_p7, %p36_p0 }
   0xf   : > { %p1236_p12 = por %p177_p8, %p42_p3  ;;  %s212_s11 = sand.u32 1, %s1128_s23  }
  0x10   : > { %s1525_s9 = scalar_select %p1232_p11, 1, 0 }
  0x11   : > { %s1526_s10 = scalar_select %p1236_p12, 1, 0 }
  0x12   : > { %s905_s12 = sshll.u32 %s1132_s24, 10  ;;  %s874_s13 = sshll.u32 %s212_s11, 6 }
  0x13   : > { %s1245_s16 = scalar_lea.hbm %s1514_s0, %s905_s12  ;;  %s216_s17 = scalar_lea.vmem [#allocation2], %s874_s13 }
  0x14   : > { %s224_s18 = sshll.u32 %s216_s17, 4  ;;  %p1249_p13 = pnand %p975_p10, %p1221_p5  ;;  %s1253_s18 = int_to_ptr.vmem [resolvable:$true] %s224_s18 }
  0x15   : > { %s1255_s20 = scalar_lea.sflag [#allocation3], %s212_s11  ;;  %s1036_s26 = scalar_lea.hbm %s1245_s16, 1024 }
  0x16   : > { %p1037_p0 = scmp.ne.s32.totalorder %s1245_s16, %s1036_s26  ;;  %p1038_p1 = pneg %p1249_p13 }
  0x17   : > { %s1041_s12 = scalar_lea.hbm %s1514_s0, 2048  ;;  %p1042_p4 = scmp.lt.s32.totalorder %s1245_s16, %s1514_s0 }
  0x18   : > { %p1039_p2 = pnand %p1038_p1, %p1037_p0  ;;  %p1043_p5 = scmp.lt.s32.totalorder %s1041_s12, %s1036_s26 }
  0x1a   : > { %p1040_p3 = pneg %p1039_p2  ;;  %p1044_p7 = por %p1043_p5, %p1042_p4 }
  0x1c   : > { %p1045_p8 = pnand %p1044_p7, %p1040_p3 }
  0x1e   : > { %1048 = shalt.err (!%p1045_p8)
}
  0x1f   : > { %s1049_s11 = scalar_lea.vmem %s1253_s18, 1024  ;;  %s1138_s14 = smov [#allocation2]  }
  0x20   : > { %p1050_p10 = scmp.ne.s32.totalorder %s1253_s18, %s1049_s11  ;;  %s1054_s15 = sshll.u32 %s1138_s14, 4  ;;  %s1055_s15 = int_to_ptr.vmem [resolvable:$false] %s1054_s15 }
  0x21   : > { %s1056_s17 = scalar_lea.vmem %s1055_s15, 2048  ;;  %p1057_p2 = scmp.lt.s32.totalorder %s1253_s18, %s1055_s15 }
  0x22   : > { %p1052_p9 = pnand %p1050_p10, %p1038_p1  ;;  %p1058_p12 = scmp.lt.s32.totalorder %s1056_s17, %s1049_s11 }
  0x24   : > { %p1053_p0 = pneg %p1052_p9  ;;  %p1059_p11 = por %p1058_p12, %p1057_p2 }
  0x26   : > { %p1060_p6 = pnand %p1059_p11, %p1053_p0 }
  0x28   : > { %1063 = shalt.err (!%p1060_p6)
}
  0x29   : > { %s1139_s26 = smov 128   ;;  %s1140_s28 = smov 8  }
  0x2a   : > { %970 = dma.hbm_to_vmem [thread:$0]  (!%p1249_p13), %s1245_s16, 1024, %s1253_s18, %s1255_s20, %s1139_s26, %s1139_s26, %s1140_s28  }
  0x2b   : > { %p878_p9 = scmp.ge.s32.totalorder %s1132_s24, 1  ;;  %p232_p1 = scmp.lt.s32.totalorder %s1132_s24, 3 }
  0x2d   : > { %p233_p3 = pnand %p878_p9, %p232_p1 }
  0x2e   : > { %s1279_s29 = sand.u32 (!%p233_p3), 1, %s1124_s22   ;;  %p1528_p6 = scmp.ne.s32.totalorder (!%p233_p3), %s1524_s8, 0 }
  0x2f   : > { %236 = sbr.rel (%p233_p3) target bundleno = 1215 (0x4bf), region = 44  ;;  %s879_s12 = sshll.u32 (!%p233_p3), %s1279_s29, 6 }
  0x30   : > { %s239_s7 = scalar_lea.sflag (!%p233_p3), [#allocation3], %s1279_s29  ;;  %s242_s13 = scalar_lea.vmem (!%p233_p3), [#allocation2], %s879_s12 }
  0x34   : > { %1111 = dma.done.wait (%p1528_p6), %s239_s7, 1024  }
  0x35   : > { %1113 = vsyncadd (%p1528_p6), %s239_s7, 4294966272  ;;  %vm282_vm0 = vcmask 523264   ;;  %v1292_v0 = vld [vmem:[%s1517_s3] sm:$0xf]  ;;  %v1297_v1 = vld [vmem:[%s1517_s3 + $0x4] sm:$0xf]  ;;  %v336_v27 = vlaneseq }
  0x36   : > { %v1302_v2 = vld [vmem:[%s1517_s3 + $0x8] sm:$0xf]  ;;  %v1307_v3 = vld [vmem:[%s1517_s3 + $0xc] sm:$0xf]  ;;  %v1312_v4 = vld [vmem:[%s1518_s4] sm:$0xff]  ;;  %v1141_v25 = vmov 0.0  }
  0x37   : > { %v1317_v5 = vld [vmem:[%s1518_s4 + $0x8] sm:$0xff]  ;;  %v1322_v6 = vld [vmem:[%s1518_s4 + $0x10] sm:$0xff]  ;;  %v1327_v7 = vld [vmem:[%s1518_s4 + $0x18] sm:$0xff]  ;;  %925 = vmatprep.subr.bf16.mxu0 %v1141_v25  ;;  %vm1142_vm1 = vmmov 0   ;;  %v337_v30 = vand.u32 127, %v336_v27  ;;  %v1372_v35 = vshrl.u32 %v336_v27, 7 }
  0x38   : > { %v1329_v8 = vld [vmem:[%s242_s13 + $0x20] sm:$0xff]  ;;  %v1335_v11 = vld [vmem:[%s242_s13 + $0x28] sm:$0xff]  ;;  %v1341_v14 = vld [vmem:[%s242_s13 + $0x18] sm:$0xff]  ;;  %929 = vmatprep.mubr.msk.bf16.mxu0 %vm1142_vm1, %v1141_v25  ;;  %vm347_vm2 = vcmask 130112   ;;  %vm354_vm3 = vcmask 195712   ;;  %vm361_vm4 = vcmask 261312  }
  0x39   : > { %v295_v9 = vsel %vm282_vm0, %v1329_v8, 0.0  ;;  %v1333_v10 = vld [vmem:[%s242_s13] sm:$0xff]  ;;  %v1337_v12 = vld [vmem:[%s242_s13 + $0x8] sm:$0xff]  ;;  %v298_v15 = vsel %vm282_vm0, %v1335_v11, 0.0  ;;  %v292_v17 = vsel %vm282_vm0, %v1341_v14, 0.0  ;;  %v1349_v18 = vld [vmem:[%s242_s13 + $0x10] sm:$0xff]  ;;  %v340_v45 = vsub.s32 %v337_v30, %v1372_v35 }
  0x3a   : > { %296 = vadd.xlane.f32.xlu1 %v295_v9  ;;  %v283_v13 = vsel %vm282_vm0, %v1333_v10, 0.0  ;;  %v286_v16 = vsel %vm282_vm0, %v1337_v12, 0.0  ;;  %v289_v19 = vsel %vm282_vm0, %v1349_v18, 0.0  ;;  %v1353_v20 = vld [vmem:[%s242_s13 + $0x38] sm:$0xff]  ;;  %v1355_v21 = vld [vmem:[%s242_s13 + $0x30] sm:$0xff]  ;;  %v1024_v24 = vld [vmem:[%s1515_s1 + $0x8] sm:$0xff]  }
  0x3b   : > { %284 = vadd.xlane.f32.xlu0 %v283_v13  ;;  %v304_v22 = vsel %vm282_vm0, %v1353_v20, 0.0  ;;  %v301_v23 = vsel %vm282_vm0, %v1355_v21, 0.0  ;;  %926 = vmatpush3.bf16.msra.mxu0 %v1024_v24  ;;  %v1025_v26 = vld [vmem:[%s1515_s1] sm:$0xff]   ;;  %v342_v38 = vadd.s32 4294967288, %v337_v30  ;;  %v349_v41 = vadd.s32 4294967280, %v337_v30  ;;  %s1412_s14 = scalar_lea.vmem [#allocation5], %s879_s12 }
  0x3c   : > { %927 = vmatprep.subr.bf16.mxu0 %v1141_v25  ;;  %v356_v50 = vadd.s32 4294967272, %v337_v30  ;;  %vm382_vm5 = vcmask 1041409   ;;  %v443_v30 = vld [vmem:[%s1516_s2] sm:$0xf]  ;;  %vm448_vm6 = vcmask 1043456   ;;  %vm397_vm7 = vcmask 261120  }
  0x3d   : > { %v345_v47 = vsub.s32 %v342_v38, %v1372_v35  ;;  %v352_v51 = vsub.s32 %v349_v41, %v1372_v35  ;;  %vm444_vm8 = vcmask 64512   ;;  %s1430_s12 = smov 0  }
  0x3e   : > { %299 = vadd.xlane.f32.xlu1 %v298_v15  ;;  %v359_v62 = vsub.s32 %v356_v50, %v1372_v35 }
  0x3f   : > { %287 = vadd.xlane.f32.xlu0 %v286_v16  ;;  %928 = vmatpush3.bf16.msra.mxu0 %v1025_v26 }
  0x40   : > { %933 = vmatprep.subr.bf16.mxu0 %v1141_v25 }
  0x42   : > { %293 = vadd.xlane.f32.xlu1 %v292_v17 }
  0x43   : > { %290 = vadd.xlane.f32.xlu0 %v289_v19 }
  0x46   : > { %305 = vadd.xlane.f32.xlu1 %v304_v22 }
  0x47   : > { %302 = vadd.xlane.f32.xlu0 %v301_v23 }
  0xc3   : > { %v297_v28 = vpop.xlane.xlu1 %296 }
  0xc4   : > { %v285_v29 = vpop.xlane.xlu0 %284  ;;  %v312_v37 = vmul.f32 0.015625, %v297_v28 }
  0xc5   : > { %v308_v34 = vmul.f32 0.015625, %v285_v29 }
  0xc7   : > { %v300_v31 = vpop.xlane.xlu1 %299 }
  0xc8   : > { %v313_v32 = vmul.f32 0.015625, %v300_v31  ;;  %v288_v33 = vpop.xlane.xlu0 %287 }
  0xc9   : > { %v309_v36 = vmul.f32 0.015625, %v288_v33 }
  0xca   : > { %v318_v42 = vpack.c.bf16 %v313_v32, %v312_v37 }
  0xcb   : > { %v316_v39 = vpack.c.bf16 %v309_v36, %v308_v34  ;;  %v294_v40 = vpop.xlane.xlu1 %293  ;;  %v450_v36 = vsel %vm448_vm6, %v443_v30, 0 }
  0xcc   : > { %v311_v43 = vmul.f32 0.015625, %v294_v40  ;;  %v291_v44 = vpop.xlane.xlu0 %290  ;;  %v332_v54 = vunpack.c.l.b16 %v318_v42  ;;  %v333_v55 = vunpack.c.h.b16 %v318_v42 }
  0xcd   : > { %v310_v46 = vmul.f32 0.015625, %v291_v44  ;;  %v328_v48 = vunpack.c.l.b16 %v316_v39  ;;  %v329_v49 = vunpack.c.h.b16 %v316_v39 }
  0xce   : > { %v366_v15 = vrot.slane %v332_v54, %v340_v45  ;;  %v370_v16 = vrot.slane %v333_v55, %v345_v47  ;;  %v500_v54 = vsub.s32 0, %v1372_v35 }
  0xcf   : > { %v317_v52 = vpack.c.bf16 %v311_v43, %v310_v46  ;;  %v306_v53 = vpop.xlane.xlu1 %305  ;;  %v341_v60 = vrot.slane %v328_v48, %v340_v45  ;;  %v346_v61 = vrot.slane %v329_v49, %v345_v47  ;;  %v1026_v43 = vld [vmem:[%s1519_s5 + $0x18] sm:$0xff]  }
  0xd0   : > { %v315_v56 = vmul.f32 0.015625, %v306_v53  ;;  %v303_v57 = vpop.xlane.xlu0 %302  ;;  %v371_v28 = vsel %vm347_vm2, %v370_v16, %v366_v15  ;;  %939 = vmatprep.subr.bf16.mxu1 %v1026_v43  ;;  %v1029_v53 = vld [vmem:[%s1519_s5] sm:$0xff]  }
  0xd1   : > { %v330_v58 = vunpack.c.l.b16 %v317_v52  ;;  %v314_v59 = vmul.f32 0.015625, %v303_v57  ;;  %v331_v63 = vunpack.c.h.b16 %v317_v52  ;;  %v348_v22 = vsel %vm347_vm2, %v346_v61, %v341_v60  ;;  %940 = vmatpush3.bf16.msra.mxu1 %v1026_v43  ;;  %v1028_v52 = vld [vmem:[%s1519_s5 + $0x8] sm:$0xff]  }
  0xd2   : > { %v519_v57 = vsub.s32 1, %v1372_v35 }
  0xd3   : > { %v353_v9 = vrot.slane %v330_v58, %v352_v51  ;;  %v319_v13 = vpack.c.bf16 %v315_v56, %v314_v59  ;;  %v360_v23 = vrot.slane %v331_v63, %v359_v62 }
  0xd5   : > { %v334_v17 = vunpack.c.l.b16 %v319_v13  ;;  %v335_v19 = vunpack.c.h.b16 %v319_v13  ;;  %v355_v24 = vsel %vm354_vm3, %v353_v9, %v348_v22 }
  0xd6   : > { %v362_v31 = vsel %vm361_vm4, %v360_v23, %v355_v24 }
  0xd7   : > { %v375_v26 = vrot.slane %v334_v17, %v352_v51  ;;  %v380_v27 = vrot.slane %v335_v19, %v359_v62  ;;  %v1027_v51 = vld [vmem:[%s1519_s5 + $0x10] sm:$0xff]  }
  0xd8   : > { %941 = vmatprep.subr.bf16.mxu1 %v1027_v51 }
  0xd9   : > { %v376_v29 = vsel %vm354_vm3, %v375_v26, %v371_v28  ;;  %942 = vmatpush3.bf16.msra.mxu1 %v1027_v51 }
  0xda   : > { %v381_v32 = vsel %vm361_vm4, %v380_v27, %v376_v29  ;;  %943 = vmatprep.subr.bf16.mxu1 %v1028_v52 }
  0xdb   : > { %v383_v33 = vsel %vm382_vm5, %v381_v32, %v362_v31 }
  0xdc   : > { %v384_v34 = vpack.c.b16 %v383_v33, %v383_v33 }
  0xdd   : > { %944 = vmatpush3.bf16.msra.mxu1 %v1028_v52 }
  0xde   : > { %930 = vmatmul.mubr.msk.bf16.vlgmr.msra.gmra.mxu0 %vm397_vm7, %v384_v34  ;;  %945 = vmatprep.subr.bf16.mxu1 %v1029_v53 }
  0xdf   : > { %934 = vmatpush3.bf16.msra.mxu0 %v450_v36  ;;  %935 = vmatprep.mubr.msk.bf16.mxu0 %vm1142_vm1, %v1141_v25 }
  0xe1   : > { %946 = vmatpush3.bf16.msra.mxu1 %v1029_v53 }
 0x19e   : > { %v435_v37 = vpop.f32.mrf.mxu0 }
 0x19f   : > { %v441_v38 = vmax.f32 %v435_v37, 0.0 }
 0x1a0   : > { %v931_v39 = vpop.f32.mrf.mxu0 }
 0x1a1   : > { %v442_v40 = vpack.c.bf16 %v441_v38, %v441_v38 }
 0x1a2   : > { %v438_v41 = vpop.f32.mrf.mxu0 }
 0x1a3   : > { %936 = vmatmul.mubr.msk.bf16.vlgmr.msra.gmra.mxu0 %vm444_vm8, %v442_v40 }
 0x1a4   : > { %v932_v42 = vpop.f32.mrf.mxu0 }
 0x263   : > { %v486_v44 = vpop.f32.mrf.mxu0 }
 0x264   : > { %v492_v45 = vsub.f32 0.0, %v486_v44 }
 0x265   : > { %v937_v46 = vpop.f32.mrf.mxu0 }
 0x266   : > { %v493_v47 = vmul.f32 1.442695, %v492_v45 }
 0x267   : > { %v489_v48 = vpop.f32.mrf.mxu0 }
 0x268   : > { %1030 = vpow2.f32 %v493_v47 }
 0x269   : > { %v938_v25 = vpop.f32.mrf.mxu0 }
 0x275   : > { %v1031_v49 = vpop.eup %1030 }
 0x276   : > { %v495_v50 = vadd.f32 1.0, %v1031_v49 }
 0x278   : > { %1032 = vrcp.f32 %v495_v50 }
 0x285   : > { %v1033_v55 = vpop.eup %1032 }
 0x286   : > { %v501_v56 = vrot.slane %v1033_v55, %v500_v54  ;;  %v520_v58 = vrot.slane %v1033_v55, %v519_v57 }
 0x288   : > { %507 = vbcast.lane.b32.xlu1 %v501_v56, 264  ;;  %503 = vbcast.lane.b32.xlu0 %v501_v56, 256 }
 0x28c   : > { %511 = vbcast.lane.b32.xlu1 %v501_v56, 272  ;;  %522 = vbcast.lane.b32.xlu0 %v520_v58, 256 }
 0x290   : > { %515 = vbcast.lane.b32.xlu1 %v501_v56, 280  ;;  %530 = vbcast.lane.b32.xlu0 %v520_v58, 272 }
 0x294   : > { %526 = vbcast.lane.b32.xlu1 %v520_v58, 264 }
 0x298   : > { %534 = vbcast.lane.b32.xlu1 %v520_v58, 280 }
 0x2fa   : > { %v508_v59 = vpop.permute.xlu1 %507  ;;  %v504_v60 = vpop.permute.xlu0 %503 }
 0x2fb   : > { %v537_v61 = vmul.f32 %v508_v59, %v1337_v12  ;;  %v536_v62 = vmul.f32 %v504_v60, %v1333_v10 }
 0x2fd   : > { %v544_v63 = vpack.c.bf16 %v537_v61, %v536_v62 }
 0x2fe   : > { %v512_v9 = vpop.permute.xlu1 %511  ;;  %v523_v35 = vpop.permute.xlu0 %522 }
 0x2ff   : > { %947 = vmatprep.mubr.msk.bf16.mxu1 %vm282_vm0, %v544_v63  ;;  %v538_v15 = vmul.f32 %v512_v9, %v1349_v18  ;;  %v540_v22 = vmul.f32 %v523_v35, %v1329_v8 }
 0x302   : > { %v516_v13 = vpop.permute.xlu1 %515  ;;  %v531_v10 = vpop.permute.xlu0 %530 }
 0x303   : > { %v539_v16 = vmul.f32 %v516_v13, %v1341_v14  ;;  %v542_v26 = vmul.f32 %v531_v10, %v1355_v21 }
 0x305   : > { %v545_v17 = vpack.c.bf16 %v539_v16, %v538_v15 }
 0x306   : > { %v527_v19 = vpop.permute.xlu1 %526 }
 0x307   : > { %v541_v23 = vmul.f32 %v527_v19, %v1335_v11  ;;  %948 = vmatmul.mubr.msk.bf16.vlgmr.msra.gmra.mxu1 %vm282_vm0, %v545_v17 }
 0x309   : > { %v546_v12 = vpack.c.bf16 %v541_v23, %v540_v22 }
 0x30a   : > { %v535_v24 = vpop.permute.xlu1 %534 }
 0x30b   : > { %v543_v27 = vmul.f32 %v535_v24, %v1353_v20  ;;  %951 = vmatprep.mubr.msk.bf16.mxu1 %vm282_vm0, %v546_v12 }
 0x30d   : > { %v547_v18 = vpack.c.bf16 %v543_v27, %v542_v26 }
 0x30f   : > { %952 = vmatmul.mubr.msk.bf16.gmra.mxu1 %vm282_vm0, %v547_v18 }
 0x3c7   : > { %v949_v14 = vpop.f32.mrf.mxu1 }
 0x3c8   : > { %659 = vst.msk [vmem:[%s1412_s14 + $0x10] sm:$0xff] %vm282_vm0, %v949_v14 }
 0x3c9   : > { %v626_v8 = vpop.f32.mrf.mxu1 }
 0x3ca   : > { %657 = vst.msk [vmem:[%s1412_s14] sm:$0xff] %vm282_vm0, %v626_v8 }
 0x3cb   : > { %v950_v11 = vpop.f32.mrf.mxu1 }
 0x3cc   : > { %660 = vst.msk [vmem:[%s1412_s14 + $0x18] sm:$0xff] %vm282_vm0, %v950_v11 }
 0x3cd   : > { %v629_v20 = vpop.f32.mrf.mxu1 }
 0x3ce   : > { %658 = vst.msk [vmem:[%s1412_s14 + $0x8] sm:$0xff] %vm282_vm0, %v629_v20 }
 0x3cf   : > { %v953_v21 = vpop.f32.mrf.mxu1 }
 0x3d0   : > { %663 = vst.msk [vmem:[%s1412_s14 + $0x30] sm:$0xff] %vm282_vm0, %v953_v21 }
 0x3d1   : > { %v642_v28 = vpop.f32.mrf.mxu1 }
 0x3d2   : > { %661 = vst.msk [vmem:[%s1412_s14 + $0x20] sm:$0xff] %vm282_vm0, %v642_v28 }
 0x3d3   : > { %v954_v29 = vpop.f32.mrf.mxu1 }
 0x3d4   : > { %664 = vst.msk [vmem:[%s1412_s14 + $0x38] sm:$0xff] %vm282_vm0, %v954_v29 }
 0x3d5   : > { %v645_v30 = vpop.f32.mrf.mxu1 }
 0x3d6   : > { %662 = vst.msk [vmem:[%s1412_s14 + $0x28] sm:$0xff] %vm282_vm0, %v645_v30 }
 0x3d7 LB: >> { %v894_v31 = vcombine.low %v1292_v0, %v1297_v1  ;;  %v1143_v32 = vmov 0   ;;  %s893_s13 = sshll.u32 %s1136_s12, 5  ;;  %v895_v40 = vcombine.low %v1302_v2, %v1307_v3  ;;  %s678_s12 = sadd.s32 1, %s1136_s12   ;;  %s1136_s12 = sphi %s1430_s12, %s678_s12  }
 0x3d8   : >> { %1035 = vset.pattern.permute.xlu1 %v1143_v32  ;;  %1034 = vset.pattern.permute.xlu0 %v1143_v32  ;;  %s1441_s15 = scalar_lea.vmem %s1412_s14, %s893_s13 [#allocation5]  ;;  %p675_p11 = scmp.ge.s32.totalorder %s678_s12, 2  }
 0x3d9   : >> { %959 = vmatprep.mubr.msk.bf16.mxu0 %vm397_vm7, %v894_v31  ;;  %699 = vperm.xlu1 %1035, %v1322_v6   ;;  %s907_s17 = sshll.u32 (%p675_p11), %s1203_s25, 10  ;;  %s791_s7 = sshll.u32 (%p675_p11), %s1412_s14, 4  ;;  %s1471_s7 = int_to_ptr.vmem [resolvable:$true] %s791_s7 }
 0x3da   : >> { %689 = vperm.xlu0 %1034, %v1312_v4   ;;  %s1468_s28 = scalar_lea.hbm (%p675_p11), %s1520_s6, %s907_s17  ;;  %s777_s16 = scalar_lea.sflag (%p675_p11), [#allocation4], %s1279_s29 }
 0x3db   : > { %s1064_s18 = scalar_lea.vmem (%p675_p11), %s1471_s7, 1024  ;;  %p1529_p13 = scmp.ne.s32.totalorder (%p675_p11), %s1525_s9, 0 }
 0x3dc   : > { %p1065_p12 = scmp.ne.s32.totalorder (%p675_p11), %s1471_s7, %s1064_s18  ;;  %s1144_s19 = smov (%p675_p11), [#allocation5]  }
 0x3dd   : >> { %v683_v33 = vld [vmem:[%s1441_s15 + $0x10] sm:$0xff]  ;;  %v684_v34 = vld [vmem:[%s1441_s15 + $0x18] sm:$0xff]  ;;  %v681_v36 = vld [vmem:[%s1441_s15] sm:$0xff]  ;;  %704 = vperm.xlu1 %1035, %v1327_v7   ;;  %s1068_s20 = sshll.u32 (%p675_p11), %s1144_s19, 4  ;;  %s1069_s20 = int_to_ptr.vmem [resolvable:$false] %s1068_s20 }
 0x3de   : >> { %v686_v37 = vpack.c.bf16 %v684_v34, %v683_v33  ;;  %v682_v38 = vld [vmem:[%s1441_s15 + $0x8] sm:$0xff]  ;;  %694 = vperm.xlu0 %1034, %v1317_v5   ;;  %p1066_p4 = pnand (%p675_p11), %p1065_p12, %p1529_p13  ;;  %s1070_s25 = scalar_lea.vmem (%p675_p11), %s1069_s20, 2048 }
 0x3df   : >> { %v685_v39 = vpack.c.bf16 %v682_v38, %v681_v36  ;;  %p1071_p7 = scmp.lt.s32.totalorder (%p675_p11), %s1471_s7, %s1069_s20  ;;  %p1072_p8 = scmp.lt.s32.totalorder (%p675_p11), %s1070_s25, %s1064_s18 }
 0x3e0   : >> { %955 = vmatprep.subr.bf16.mxu0 %v686_v37  ;;  %p1067_p5 = pneg (%p675_p11), %p1066_p4 }
 0x3e1   : >> { %956 = vmatpush3.bf16.msra.mxu0 %v686_v37  ;;  %p1073_p10 = por (%p675_p11), %p1072_p8, %p1071_p7 }
 0x3e2   : >> { %957 = vmatprep.subr.bf16.mxu0 %v685_v39 }
 0x3e3   : > { %p1074_p0 = pnand (%p675_p11), %p1073_p10, %p1067_p5 }
 0x3e5   : >> { %958 = vmatpush3.bf16.msra.mxu0 %v685_v39 }
 0x3e8   : >> { %960 = vmatmul.mubr.msk.bf16.vlgmr.msra.gmra.mxu0 %vm397_vm7, %v895_v40 }
 0x454   : >> { %v700_v41 = vpop.permute.xlu1 %699 }
 0x455   : >> { %v690_v42 = vpop.permute.xlu0 %689 }
 0x458   : >> { %v705_v47 = vpop.permute.xlu1 %704 }
 0x459   : >> { %v695_v49 = vpop.permute.xlu0 %694 }
 0x4a8   : >> { %v961_v43 = vpop.f32.mrf.mxu0 }
 0x4a9   : >> { %v766_v44 = vadd.f32 %v961_v43, %v700_v41 }
 0x4aa   : >> { %v757_v45 = vpop.f32.mrf.mxu0 }
 0x4ab   : >> { %774 = vst.msk [vmem:[%s1441_s15 + $0x10] sm:$0xff] %vm282_vm0, %v766_v44  ;;  %v758_v46 = vadd.f32 %v757_v45, %v690_v42 }
 0x4ac   : >> { %v962_v48 = vpop.f32.mrf.mxu0 }
 0x4ad   : >> { %772 = vst.msk [vmem:[%s1441_s15] sm:$0xff] %vm282_vm0, %v758_v46  ;;  %v769_v25 = vadd.f32 %v962_v48, %v705_v47  ;;  %677 = sbr.rel (!%p675_p11) target bundleno = 983 (0x3d7), region = 97 }
 0x4ae   : >> { %v760_v50 = vpop.f32.mrf.mxu0 }
 0x4af   : >> { %775 = vst.msk [vmem:[%s1441_s15 + $0x18] sm:$0xff] %vm282_vm0, %v769_v25  ;;  %v761_v51 = vadd.f32 %v760_v50, %v695_v49 }
 0x4b1   : >> { %773 = vst.msk [vmem:[%s1441_s15 + $0x8] sm:$0xff] %vm282_vm0, %v761_v51 }
 0x4b2   : > { %1077 = shalt.err (!%p1074_p0)
}
 0x4b3   : > { %s1078_s11 = scalar_lea.hbm %s1468_s28, 1024  ;;  %s1082_s13 = scalar_lea.hbm %s1520_s6, 2048 }
 0x4b4   : > { %p1079_p2 = scmp.ne.s32.totalorder %s1468_s28, %s1078_s11  ;;  %p1083_p3 = scmp.lt.s32.totalorder %s1468_s28, %s1520_s6 }
 0x4b5   : > { %p1084_p6 = scmp.lt.s32.totalorder %s1082_s13, %s1078_s11 }
 0x4b6   : > { %p1080_p9 = pnand %p1079_p2, %p1529_p13 }
 0x4b7   : > { %p1085_p11 = por %p1084_p6, %p1083_p3 }
 0x4b8   : > { %p1081_p1 = pneg %p1080_p9 }
 0x4ba   : > { %p1086_p12 = pnand %p1085_p11, %p1081_p1 }
 0x4bc   : > { %1089 = shalt.err (!%p1086_p12)
}
 0x4bd   : > { %s1145_s8 = smov 128   ;;  %s1146_s26 = smov 8  }
 0x4be   : > { %965 = dma.vmem_to_hbm [thread:$0]  (%p1529_p13), %s1471_s7, 1024, %s1468_s28, %s777_s16, %s1145_s8, %s1145_s8, %s1146_s26  }
 0x4bf PF: > { %s806_s18 = sand.u32 1, %s1120_s21   ;;  %p1530_p4 = scmp.ne.s32.totalorder %s1526_s10, 0 }
 0x4c0   : > { %p1531_p5 = scmp.ge.s32.totalorder %s1132_s24, 2  ;;  %s807_s19 = scalar_lea.sflag [#allocation4], %s806_s18 }
 0x4c2   : > { %p972_p7 = pnand %p1531_p5, %p1530_p4 }
 0x4c4   : > { %p973_p8 = pneg %p972_p7 }
 0x4c6   : > { %1115 = dma.done.wait (%p973_p8), %s807_s19, 1024  }
 0x4c7   : > { %1117 = vsyncadd (%p973_p8), %s807_s19, 4294966272  ;;  %p19_p10 = scmp.ge.s32.totalorder %s1207_s27, 4   ;;  %s1532_s21 = smov %s1124_s22 }
 0x4c8   : > { %s1533_s22 = smov %s1128_s23  ;;  %s1534_s23 = smov %s1219_s30 }
 0x4c9   : > { %s1535_s24 = smov %s1207_s27  ;;  %21 = sbr.rel (!%p19_p10) target bundleno = 5 (0x5), region = 108 }
 0x4ce   :  { %812 = vsyncpa [#allocation3], 1 }
 0x4cf   :  { %814 = vsyncpa [#allocation3 + $0x1], 1 }
 0x4d0   :  { %815 = vsyncpa [#allocation4], 1 }
 0x4d1   :  { %817 = vsyncpa [#allocation4 + $0x1], 1 }

</bundles_post_ra>
